<compile_context>
chip_gen: v7x
topology: tpu7x:2x2x1
jax: 0.10.0
libtpu: 0.0.40
codegen_flags: <defaults>
</compile_context>

<pallas_src>
import functools

import jax
import jax.numpy as jnp
from jax.experimental import pallas as pl
from jax.experimental.pallas import tpu as pltpu


def lstm_pred_kernel(x_ref, wih_ref, whh_ref, b_ref,
                     w1_ref, b1_ref, w2_ref, b2_ref,
                     out_ref, *, seq_len, batch_pad):
    S = seq_len
    B = batch_pad
    H2 = whh_ref.shape[0]

    # ---- Hoisted, batched input projection for ALL time steps (one matmul) ----
    # (S*B, D) @ (D, 4H2) + bias  -> (S*B, 4H2)
    gates_x = (jnp.dot(x_ref[...], wih_ref[...],
                       preferred_element_type=jnp.float32)
               + b_ref[...])

    whh = whh_ref[...]  # (H2, 4H2), resident in vregs across the unrolled loop

    # Lane mask selecting the 'g' gate block (PyTorch gate order [i, f, g, o]):
    # tanh on lanes [2*H2, 3*H2), sigmoid elsewhere.  Activations are applied
    # on the full lane-aligned (B, 4H2) tensor; slicing happens only for the
    # cheap VPU multiplies afterwards.
    lane = jax.lax.broadcasted_iota(jnp.int32, (B, 4 * H2), 1)
    g_mask = (lane >= 2 * H2) & (lane < 3 * H2)

    h = jnp.zeros((B, H2), jnp.float32)
    c = jnp.zeros((B, H2), jnp.float32)
    hs = []

    # ---- Serial recurrence: only h @ W_hh + elementwise per step (unrolled) ----
    for t in range(S):
        gates = gates_x[t * B:(t + 1) * B, :] + jnp.dot(
            h, whh, preferred_element_type=jnp.float32)
        act = jnp.where(g_mask, jnp.tanh(gates), jax.nn.sigmoid(gates))
        i_g = act[:, 0 * H2:1 * H2]
        f_g = act[:, 1 * H2:2 * H2]
        g_g = act[:, 2 * H2:3 * H2]
        o_g = act[:, 3 * H2:4 * H2]
        c = f_g * c + i_g * g_g
        h = o_g * jnp.tanh(c)
        hs.append(h)

    # ---- Batched head: fc1 -> ReLU -> fc2 on the whole (S*B, H2) slab ----
    hs_all = jnp.concatenate(hs, axis=0)  # (S*B, H2)
    y = jnp.dot(hs_all, w1_ref[...], preferred_element_type=jnp.float32) + b1_ref[...]
    y = jnp.maximum(y, 0.0)
    out = jnp.dot(y, w2_ref[...], preferred_element_type=jnp.float32) + b2_ref[...]

    # Single one-shot store of the whole result.
    out_ref[...] = out.astype(out_ref.dtype)


def lstm_prediction(x, params):
    """x: (S, B, D) float32.  params: dict of pre-transposed weights."""
    S, B, D = x.shape
    wih_t = params["wih_t"]   # (D, 4*H2)
    whh_t = params["whh_t"]   # (H2, 4*H2)
    b = params["b"]           # (1, 4*H2)  = bias_ih + bias_hh
    w1_t = params["w1_t"]     # (H2, H)
    b1 = params["b1"]         # (1, H)
    w2_t = params["w2_t"]     # (H, O)
    b2 = params["b2"]         # (1, O)
    O = w2_t.shape[1]

    # Pad batch up to the f32 sublane minimum so per-step row slices are
    # sublane-tile aligned inside the kernel.  Padded rows are dropped at the end.
    B_pad = ((B + 7) // 8) * 8
    if B_pad != B:
        x = jnp.pad(x, ((0, 0), (0, B_pad - B), (0, 0)))
    x2d = x.reshape(S * B_pad, D)

    kernel = functools.partial(lstm_pred_kernel, seq_len=S, batch_pad=B_pad)

    vmem_spec = pl.BlockSpec(memory_space=pltpu.MemorySpace.VMEM)
    out2d = pl.pallas_call(
        kernel,
        out_shape=jax.ShapeDtypeStruct((S * B_pad, O), jnp.float32),
        in_specs=[vmem_spec] * 8,
        out_specs=vmem_spec,
    )(x2d, wih_t, whh_t, b, w1_t, b1, w2_t, b2)

    return out2d.reshape(S, B_pad, O)[:, :B, :]


def init_params(key, input_dim, hidden_dim, output_dim):
    """Deterministic init matching PyTorch parameter shapes (uniform +/- 1/sqrt)."""
    H2 = hidden_dim * 2
    ks = jax.random.split(key, 8)
    s_lstm = 1.0 / jnp.sqrt(H2)
    s_fc1 = 1.0 / jnp.sqrt(H2)
    s_fc2 = 1.0 / jnp.sqrt(hidden_dim)

    w_ih = jax.random.uniform(ks[0], (4 * H2, input_dim), jnp.float32, -s_lstm, s_lstm)
    w_hh = jax.random.uniform(ks[1], (4 * H2, H2), jnp.float32, -s_lstm, s_lstm)
    b_ih = jax.random.uniform(ks[2], (4 * H2,), jnp.float32, -s_lstm, s_lstm)
    b_hh = jax.random.uniform(ks[3], (4 * H2,), jnp.float32, -s_lstm, s_lstm)
    w1 = jax.random.uniform(ks[4], (hidden_dim, H2), jnp.float32, -s_fc1, s_fc1)
    b1 = jax.random.uniform(ks[5], (hidden_dim,), jnp.float32, -s_fc1, s_fc1)
    w2 = jax.random.uniform(ks[6], (output_dim, hidden_dim), jnp.float32, -s_fc2, s_fc2)
    b2 = jax.random.uniform(ks[7], (output_dim,), jnp.float32, -s_fc2, s_fc2)

    return {
        "wih_t": w_ih.T,                      # (D, 4H2)
        "whh_t": w_hh.T,                      # (H2, 4H2)
        "b": (b_ih + b_hh)[None, :],          # (1, 4H2)
        "w1_t": w1.T,                         # (H2, H)
        "b1": b1[None, :],                    # (1, H)
        "w2_t": w2.T,                         # (H, O)
        "b2": b2[None, :],                    # (1, O)
    }


def reference(x, params):
    """Pure-JAX reference of the same forward pass (for verification)."""
    H2 = params["whh_t"].shape[0]

    def step(carry, x_t):
        h, c = carry
        gates = x_t @ params["wih_t"] + h @ params["whh_t"] + params["b"]
        i = jax.nn.sigmoid(gates[:, 0 * H2:1 * H2])
        f = jax.nn.sigmoid(gates[:, 1 * H2:2 * H2])
        g = jnp.tanh(gates[:, 2 * H2:3 * H2])
        o = jax.nn.sigmoid(gates[:, 3 * H2:4 * H2])
        c = f * c + i * g
        h = o * jnp.tanh(c)
        return (h, c), h

    B = x.shape[1]
    h0 = jnp.zeros((B, H2), jnp.float32)
    c0 = jnp.zeros((B, H2), jnp.float32)
    _, hs = jax.lax.scan(step, (h0, c0), x)
    y = jnp.maximum(hs @ params["w1_t"] + params["b1"], 0.0)
    return y @ params["w2_t"] + params["b2"]


if __name__ == "__main__":
    seq_len, batch, input_dim, hidden_dim, output_dim = 8, 4, 16, 32, 8

    key = jax.random.PRNGKey(0)
    k_x, k_p = jax.random.split(key)
    x = jax.random.normal(k_x, (seq_len, batch, input_dim), jnp.float32)
    params = init_params(k_p, input_dim, hidden_dim, output_dim)

    out = lstm_prediction(x, params)
    out = jax.block_until_ready(out)

    ref = reference(x, params)
    assert out.shape == (seq_len, batch, output_dim)
    assert jnp.allclose(out, ref, atol=1e-4, rtol=1e-4), "mismatch vs reference"

    print("KERNEL_OK")
</pallas_src>

<mosaic_0001>
module attributes {stable_mosaic.version = 11 : i64} {
  func.func @lstm_pred_kernel(%arg0: memref<64x16xf32, #tpu.memory_space<vmem>>, %arg1: memref<16x256xf32, #tpu.memory_space<vmem>>, %arg2: memref<64x256xf32, #tpu.memory_space<vmem>>, %arg3: memref<1x256xf32, #tpu.memory_space<vmem>>, %arg4: memref<64x32xf32, #tpu.memory_space<vmem>>, %arg5: memref<1x32xf32, #tpu.memory_space<vmem>>, %arg6: memref<32x8xf32, #tpu.memory_space<vmem>>, %arg7: memref<1x8xf32, #tpu.memory_space<vmem>>, %arg8: memref<64x8xf32, #tpu.memory_space<vmem>>) attributes {dimension_semantics = [], scalar_prefetch = 0 : i64, scratch_operands = 0 : i64, tpu.core_type = #tpu.core_type<tc>} {
    %c0 = arith.constant 0 : index
    %c0_0 = arith.constant 0 : index
    %0 = vector.load %arg0[%c0, %c0_0] : memref<64x16xf32, #tpu.memory_space<vmem>>, vector<64x16xf32>
    %c0_1 = arith.constant 0 : index
    %c0_2 = arith.constant 0 : index
    %1 = vector.load %arg1[%c0_1, %c0_2] : memref<16x256xf32, #tpu.memory_space<vmem>>, vector<16x256xf32>
    %cst = arith.constant dense<0.000000e+00> : vector<64x256xf32>
    %2 = tpu.matmul %0, %1, %cst {dimension_numbers = #tpu.dot_dimension_numbers<[1], [0], [0], [1], [0, 0, 1, 1], [], []>} : vector<64x16xf32>, vector<16x256xf32>, vector<64x256xf32> -> vector<64x256xf32>
    %c0_3 = arith.constant 0 : index
    %c0_4 = arith.constant 0 : index
    %3 = vector.load %arg3[%c0_3, %c0_4] : memref<1x256xf32, #tpu.memory_space<vmem>>, vector<1x256xf32>
    %4 = vector.broadcast %3 : vector<1x256xf32> to vector<64x256xf32>
    %5 = arith.addf %2, %4 : vector<64x256xf32>
    %c0_5 = arith.constant 0 : index
    %c0_6 = arith.constant 0 : index
    %6 = vector.load %arg2[%c0_5, %c0_6] : memref<64x256xf32, #tpu.memory_space<vmem>>, vector<64x256xf32>
    %7 = tpu.iota {dimensions = array<i32: 1>} : vector<8x256xi32>
    %c128_i32 = arith.constant 128 : i32
    %8 = vector.broadcast %c128_i32 : i32 to vector<8x256xi32>
    %9 = arith.cmpi sge, %7, %8 : vector<8x256xi32>
    %c192_i32 = arith.constant 192 : i32
    %10 = vector.broadcast %c192_i32 : i32 to vector<8x256xi32>
    %11 = arith.cmpi slt, %7, %10 : vector<8x256xi32>
    %12 = arith.andi %9, %11 : vector<8x256xi1>
    %cst_7 = arith.constant 0.000000e+00 : f32
    %13 = vector.broadcast %cst_7 : f32 to vector<8x64xf32>
    %cst_8 = arith.constant 0.000000e+00 : f32
    %14 = vector.broadcast %cst_8 : f32 to vector<8x64xf32>
    %15 = vector.extract_strided_slice %5 {offsets = [0, 0], sizes = [8, 256], strides = [1, 1]} : vector<64x256xf32> to vector<8x256xf32>
    %cst_9 = arith.constant dense<0.000000e+00> : vector<8x256xf32>
    %16 = tpu.matmul %13, %6, %cst_9 {dimension_numbers = #tpu.dot_dimension_numbers<[1], [0], [0], [1], [0, 0, 1, 1], [], []>} : vector<8x64xf32>, vector<64x256xf32>, vector<8x256xf32> -> vector<8x256xf32>
    %17 = arith.addf %15, %16 : vector<8x256xf32>
    %18 = math.tanh %17 : vector<8x256xf32>
    %19 = arith.negf %17 : vector<8x256xf32>
    %20 = math.exp %19 : vector<8x256xf32>
    %cst_10 = arith.constant 1.000000e+00 : f32
    %21 = vector.broadcast %cst_10 : f32 to vector<8x256xf32>
    %22 = arith.addf %21, %20 : vector<8x256xf32>
    %23 = arith.divf %21, %22 : vector<8x256xf32>
    %24 = arith.select %12, %18, %23 : vector<8x256xi1>, vector<8x256xf32>
    %25 = vector.extract_strided_slice %24 {offsets = [0, 0], sizes = [8, 64], strides = [1, 1]} : vector<8x256xf32> to vector<8x64xf32>
    %26 = vector.extract_strided_slice %24 {offsets = [0, 64], sizes = [8, 64], strides = [1, 1]} : vector<8x256xf32> to vector<8x64xf32>
    %27 = vector.extract_strided_slice %24 {offsets = [0, 128], sizes = [8, 64], strides = [1, 1]} : vector<8x256xf32> to vector<8x64xf32>
    %28 = vector.extract_strided_slice %24 {offsets = [0, 192], sizes = [8, 64], strides = [1, 1]} : vector<8x256xf32> to vector<8x64xf32>
    %29 = arith.mulf %26, %14 : vector<8x64xf32>
    %30 = arith.mulf %25, %27 : vector<8x64xf32>
    %31 = arith.addf %29, %30 : vector<8x64xf32>
    %32 = math.tanh %31 : vector<8x64xf32>
    %33 = arith.mulf %28, %32 : vector<8x64xf32>
    %34 = vector.extract_strided_slice %5 {offsets = [8, 0], sizes = [8, 256], strides = [1, 1]} : vector<64x256xf32> to vector<8x256xf32>
    %cst_11 = arith.constant dense<0.000000e+00> : vector<8x256xf32>
    %35 = tpu.matmul %33, %6, %cst_11 {dimension_numbers = #tpu.dot_dimension_numbers<[1], [0], [0], [1], [0, 0, 1, 1], [], []>} : vector<8x64xf32>, vector<64x256xf32>, vector<8x256xf32> -> vector<8x256xf32>
    %36 = arith.addf %34, %35 : vector<8x256xf32>
    %37 = math.tanh %36 : vector<8x256xf32>
    %38 = arith.negf %36 : vector<8x256xf32>
    %39 = math.exp %38 : vector<8x256xf32>
    %cst_12 = arith.constant 1.000000e+00 : f32
    %40 = vector.broadcast %cst_12 : f32 to vector<8x256xf32>
    %41 = arith.addf %40, %39 : vector<8x256xf32>
    %42 = arith.divf %40, %41 : vector<8x256xf32>
    %43 = arith.select %12, %37, %42 : vector<8x256xi1>, vector<8x256xf32>
    %44 = vector.extract_strided_slice %43 {offsets = [0, 0], sizes = [8, 64], strides = [1, 1]} : vector<8x256xf32> to vector<8x64xf32>
    %45 = vector.extract_strided_slice %43 {offsets = [0, 64], sizes = [8, 64], strides = [1, 1]} : vector<8x256xf32> to vector<8x64xf32>
    %46 = vector.extract_strided_slice %43 {offsets = [0, 128], sizes = [8, 64], strides = [1, 1]} : vector<8x256xf32> to vector<8x64xf32>
    %47 = vector.extract_strided_slice %43 {offsets = [0, 192], sizes = [8, 64], strides = [1, 1]} : vector<8x256xf32> to vector<8x64xf32>
    %48 = arith.mulf %45, %31 : vector<8x64xf32>
    %49 = arith.mulf %44, %46 : vector<8x64xf32>
    %50 = arith.addf %48, %49 : vector<8x64xf32>
    %51 = math.tanh %50 : vector<8x64xf32>
    %52 = arith.mulf %47, %51 : vector<8x64xf32>
    %53 = vector.extract_strided_slice %5 {offsets = [16, 0], sizes = [8, 256], strides = [1, 1]} : vector<64x256xf32> to vector<8x256xf32>
    %cst_13 = arith.constant dense<0.000000e+00> : vector<8x256xf32>
    %54 = tpu.matmul %52, %6, %cst_13 {dimension_numbers = #tpu.dot_dimension_numbers<[1], [0], [0], [1], [0, 0, 1, 1], [], []>} : vector<8x64xf32>, vector<64x256xf32>, vector<8x256xf32> -> vector<8x256xf32>
    %55 = arith.addf %53, %54 : vector<8x256xf32>
    %56 = math.tanh %55 : vector<8x256xf32>
    %57 = arith.negf %55 : vector<8x256xf32>
    %58 = math.exp %57 : vector<8x256xf32>
    %cst_14 = arith.constant 1.000000e+00 : f32
    %59 = vector.broadcast %cst_14 : f32 to vector<8x256xf32>
    %60 = arith.addf %59, %58 : vector<8x256xf32>
    %61 = arith.divf %59, %60 : vector<8x256xf32>
    %62 = arith.select %12, %56, %61 : vector<8x256xi1>, vector<8x256xf32>
    %63 = vector.extract_strided_slice %62 {offsets = [0, 0], sizes = [8, 64], strides = [1, 1]} : vector<8x256xf32> to vector<8x64xf32>
    %64 = vector.extract_strided_slice %62 {offsets = [0, 64], sizes = [8, 64], strides = [1, 1]} : vector<8x256xf32> to vector<8x64xf32>
    %65 = vector.extract_strided_slice %62 {offsets = [0, 128], sizes = [8, 64], strides = [1, 1]} : vector<8x256xf32> to vector<8x64xf32>
    %66 = vector.extract_strided_slice %62 {offsets = [0, 192], sizes = [8, 64], strides = [1, 1]} : vector<8x256xf32> to vector<8x64xf32>
    %67 = arith.mulf %64, %50 : vector<8x64xf32>
    %68 = arith.mulf %63, %65 : vector<8x64xf32>
    %69 = arith.addf %67, %68 : vector<8x64xf32>
    %70 = math.tanh %69 : vector<8x64xf32>
    %71 = arith.mulf %66, %70 : vector<8x64xf32>
    %72 = vector.extract_strided_slice %5 {offsets = [24, 0], sizes = [8, 256], strides = [1, 1]} : vector<64x256xf32> to vector<8x256xf32>
    %cst_15 = arith.constant dense<0.000000e+00> : vector<8x256xf32>
    %73 = tpu.matmul %71, %6, %cst_15 {dimension_numbers = #tpu.dot_dimension_numbers<[1], [0], [0], [1], [0, 0, 1, 1], [], []>} : vector<8x64xf32>, vector<64x256xf32>, vector<8x256xf32> -> vector<8x256xf32>
    %74 = arith.addf %72, %73 : vector<8x256xf32>
    %75 = math.tanh %74 : vector<8x256xf32>
    %76 = arith.negf %74 : vector<8x256xf32>
    %77 = math.exp %76 : vector<8x256xf32>
    %cst_16 = arith.constant 1.000000e+00 : f32
    %78 = vector.broadcast %cst_16 : f32 to vector<8x256xf32>
    %79 = arith.addf %78, %77 : vector<8x256xf32>
    %80 = arith.divf %78, %79 : vector<8x256xf32>
    %81 = arith.select %12, %75, %80 : vector<8x256xi1>, vector<8x256xf32>
    %82 = vector.extract_strided_slice %81 {offsets = [0, 0], sizes = [8, 64], strides = [1, 1]} : vector<8x256xf32> to vector<8x64xf32>
    %83 = vector.extract_strided_slice %81 {offsets = [0, 64], sizes = [8, 64], strides = [1, 1]} : vector<8x256xf32> to vector<8x64xf32>
    %84 = vector.extract_strided_slice %81 {offsets = [0, 128], sizes = [8, 64], strides = [1, 1]} : vector<8x256xf32> to vector<8x64xf32>
    %85 = vector.extract_strided_slice %81 {offsets = [0, 192], sizes = [8, 64], strides = [1, 1]} : vector<8x256xf32> to vector<8x64xf32>
    %86 = arith.mulf %83, %69 : vector<8x64xf32>
    %87 = arith.mulf %82, %84 : vector<8x64xf32>
    %88 = arith.addf %86, %87 : vector<8x64xf32>
    %89 = math.tanh %88 : vector<8x64xf32>
    %90 = arith.mulf %85, %89 : vector<8x64xf32>
    %91 = vector.extract_strided_slice %5 {offsets = [32, 0], sizes = [8, 256], strides = [1, 1]} : vector<64x256xf32> to vector<8x256xf32>
    %cst_17 = arith.constant dense<0.000000e+00> : vector<8x256xf32>
    %92 = tpu.matmul %90, %6, %cst_17 {dimension_numbers = #tpu.dot_dimension_numbers<[1], [0], [0], [1], [0, 0, 1, 1], [], []>} : vector<8x64xf32>, vector<64x256xf32>, vector<8x256xf32> -> vector<8x256xf32>
    %93 = arith.addf %91, %92 : vector<8x256xf32>
    %94 = math.tanh %93 : vector<8x256xf32>
    %95 = arith.negf %93 : vector<8x256xf32>
    %96 = math.exp %95 : vector<8x256xf32>
    %cst_18 = arith.constant 1.000000e+00 : f32
    %97 = vector.broadcast %cst_18 : f32 to vector<8x256xf32>
    %98 = arith.addf %97, %96 : vector<8x256xf32>
    %99 = arith.divf %97, %98 : vector<8x256xf32>
    %100 = arith.select %12, %94, %99 : vector<8x256xi1>, vector<8x256xf32>
    %101 = vector.extract_strided_slice %100 {offsets = [0, 0], sizes = [8, 64], strides = [1, 1]} : vector<8x256xf32> to vector<8x64xf32>
    %102 = vector.extract_strided_slice %100 {offsets = [0, 64], sizes = [8, 64], strides = [1, 1]} : vector<8x256xf32> to vector<8x64xf32>
    %103 = vector.extract_strided_slice %100 {offsets = [0, 128], sizes = [8, 64], strides = [1, 1]} : vector<8x256xf32> to vector<8x64xf32>
    %104 = vector.extract_strided_slice %100 {offsets = [0, 192], sizes = [8, 64], strides = [1, 1]} : vector<8x256xf32> to vector<8x64xf32>
    %105 = arith.mulf %102, %88 : vector<8x64xf32>
    %106 = arith.mulf %101, %103 : vector<8x64xf32>
    %107 = arith.addf %105, %106 : vector<8x64xf32>
    %108 = math.tanh %107 : vector<8x64xf32>
    %109 = arith.mulf %104, %108 : vector<8x64xf32>
    %110 = vector.extract_strided_slice %5 {offsets = [40, 0], sizes = [8, 256], strides = [1, 1]} : vector<64x256xf32> to vector<8x256xf32>
    %cst_19 = arith.constant dense<0.000000e+00> : vector<8x256xf32>
    %111 = tpu.matmul %109, %6, %cst_19 {dimension_numbers = #tpu.dot_dimension_numbers<[1], [0], [0], [1], [0, 0, 1, 1], [], []>} : vector<8x64xf32>, vector<64x256xf32>, vector<8x256xf32> -> vector<8x256xf32>
    %112 = arith.addf %110, %111 : vector<8x256xf32>
    %113 = math.tanh %112 : vector<8x256xf32>
    %114 = arith.negf %112 : vector<8x256xf32>
    %115 = math.exp %114 : vector<8x256xf32>
    %cst_20 = arith.constant 1.000000e+00 : f32
    %116 = vector.broadcast %cst_20 : f32 to vector<8x256xf32>
    %117 = arith.addf %116, %115 : vector<8x256xf32>
    %118 = arith.divf %116, %117 : vector<8x256xf32>
    %119 = arith.select %12, %113, %118 : vector<8x256xi1>, vector<8x256xf32>
    %120 = vector.extract_strided_slice %119 {offsets = [0, 0], sizes = [8, 64], strides = [1, 1]} : vector<8x256xf32> to vector<8x64xf32>
    %121 = vector.extract_strided_slice %119 {offsets = [0, 64], sizes = [8, 64], strides = [1, 1]} : vector<8x256xf32> to vector<8x64xf32>
    %122 = vector.extract_strided_slice %119 {offsets = [0, 128], sizes = [8, 64], strides = [1, 1]} : vector<8x256xf32> to vector<8x64xf32>
    %123 = vector.extract_strided_slice %119 {offsets = [0, 192], sizes = [8, 64], strides = [1, 1]} : vector<8x256xf32> to vector<8x64xf32>
    %124 = arith.mulf %121, %107 : vector<8x64xf32>
    %125 = arith.mulf %120, %122 : vector<8x64xf32>
    %126 = arith.addf %124, %125 : vector<8x64xf32>
    %127 = math.tanh %126 : vector<8x64xf32>
    %128 = arith.mulf %123, %127 : vector<8x64xf32>
    %129 = vector.extract_strided_slice %5 {offsets = [48, 0], sizes = [8, 256], strides = [1, 1]} : vector<64x256xf32> to vector<8x256xf32>
    %cst_21 = arith.constant dense<0.000000e+00> : vector<8x256xf32>
    %130 = tpu.matmul %128, %6, %cst_21 {dimension_numbers = #tpu.dot_dimension_numbers<[1], [0], [0], [1], [0, 0, 1, 1], [], []>} : vector<8x64xf32>, vector<64x256xf32>, vector<8x256xf32> -> vector<8x256xf32>
    %131 = arith.addf %129, %130 : vector<8x256xf32>
    %132 = math.tanh %131 : vector<8x256xf32>
    %133 = arith.negf %131 : vector<8x256xf32>
    %134 = math.exp %133 : vector<8x256xf32>
    %cst_22 = arith.constant 1.000000e+00 : f32
    %135 = vector.broadcast %cst_22 : f32 to vector<8x256xf32>
    %136 = arith.addf %135, %134 : vector<8x256xf32>
    %137 = arith.divf %135, %136 : vector<8x256xf32>
    %138 = arith.select %12, %132, %137 : vector<8x256xi1>, vector<8x256xf32>
    %139 = vector.extract_strided_slice %138 {offsets = [0, 0], sizes = [8, 64], strides = [1, 1]} : vector<8x256xf32> to vector<8x64xf32>
    %140 = vector.extract_strided_slice %138 {offsets = [0, 64], sizes = [8, 64], strides = [1, 1]} : vector<8x256xf32> to vector<8x64xf32>
    %141 = vector.extract_strided_slice %138 {offsets = [0, 128], sizes = [8, 64], strides = [1, 1]} : vector<8x256xf32> to vector<8x64xf32>
    %142 = vector.extract_strided_slice %138 {offsets = [0, 192], sizes = [8, 64], strides = [1, 1]} : vector<8x256xf32> to vector<8x64xf32>
    %143 = arith.mulf %140, %126 : vector<8x64xf32>
    %144 = arith.mulf %139, %141 : vector<8x64xf32>
    %145 = arith.addf %143, %144 : vector<8x64xf32>
    %146 = math.tanh %145 : vector<8x64xf32>
    %147 = arith.mulf %142, %146 : vector<8x64xf32>
    %148 = vector.extract_strided_slice %5 {offsets = [56, 0], sizes = [8, 256], strides = [1, 1]} : vector<64x256xf32> to vector<8x256xf32>
    %cst_23 = arith.constant dense<0.000000e+00> : vector<8x256xf32>
    %149 = tpu.matmul %147, %6, %cst_23 {dimension_numbers = #tpu.dot_dimension_numbers<[1], [0], [0], [1], [0, 0, 1, 1], [], []>} : vector<8x64xf32>, vector<64x256xf32>, vector<8x256xf32> -> vector<8x256xf32>
    %150 = arith.addf %148, %149 : vector<8x256xf32>
    %151 = math.tanh %150 : vector<8x256xf32>
    %152 = arith.negf %150 : vector<8x256xf32>
    %153 = math.exp %152 : vector<8x256xf32>
    %cst_24 = arith.constant 1.000000e+00 : f32
    %154 = vector.broadcast %cst_24 : f32 to vector<8x256xf32>
    %155 = arith.addf %154, %153 : vector<8x256xf32>
    %156 = arith.divf %154, %155 : vector<8x256xf32>
    %157 = arith.select %12, %151, %156 : vector<8x256xi1>, vector<8x256xf32>
    %158 = vector.extract_strided_slice %157 {offsets = [0, 0], sizes = [8, 64], strides = [1, 1]} : vector<8x256xf32> to vector<8x64xf32>
    %159 = vector.extract_strided_slice %157 {offsets = [0, 64], sizes = [8, 64], strides = [1, 1]} : vector<8x256xf32> to vector<8x64xf32>
    %160 = vector.extract_strided_slice %157 {offsets = [0, 128], sizes = [8, 64], strides = [1, 1]} : vector<8x256xf32> to vector<8x64xf32>
    %161 = vector.extract_strided_slice %157 {offsets = [0, 192], sizes = [8, 64], strides = [1, 1]} : vector<8x256xf32> to vector<8x64xf32>
    %162 = arith.mulf %159, %145 : vector<8x64xf32>
    %163 = arith.mulf %158, %160 : vector<8x64xf32>
    %164 = arith.addf %162, %163 : vector<8x64xf32>
    %165 = math.tanh %164 : vector<8x64xf32>
    %166 = arith.mulf %161, %165 : vector<8x64xf32>
    %167 = tpu.concatenate %33, %52, %71, %90, %109, %128, %147, %166 in 0 : vector<8x64xf32>, vector<8x64xf32>, vector<8x64xf32>, vector<8x64xf32>, vector<8x64xf32>, vector<8x64xf32>, vector<8x64xf32>, vector<8x64xf32> -> vector<64x64xf32>
    %c0_25 = arith.constant 0 : index
    %c0_26 = arith.constant 0 : index
    %168 = vector.load %arg4[%c0_25, %c0_26] : memref<64x32xf32, #tpu.memory_space<vmem>>, vector<64x32xf32>
    %cst_27 = arith.constant dense<0.000000e+00> : vector<64x32xf32>
    %169 = tpu.matmul %167, %168, %cst_27 {dimension_numbers = #tpu.dot_dimension_numbers<[1], [0], [0], [1], [0, 0, 1, 1], [], []>} : vector<64x64xf32>, vector<64x32xf32>, vector<64x32xf32> -> vector<64x32xf32>
    %c0_28 = arith.constant 0 : index
    %c0_29 = arith.constant 0 : index
    %170 = vector.load %arg5[%c0_28, %c0_29] : memref<1x32xf32, #tpu.memory_space<vmem>>, vector<1x32xf32>
    %171 = vector.broadcast %170 : vector<1x32xf32> to vector<64x32xf32>
    %172 = arith.addf %169, %171 : vector<64x32xf32>
    %cst_30 = arith.constant 0.000000e+00 : f32
    %173 = vector.broadcast %cst_30 : f32 to vector<64x32xf32>
    %174 = arith.maximumf %172, %173 : vector<64x32xf32>
    %c0_31 = arith.constant 0 : index
    %c0_32 = arith.constant 0 : index
    %175 = vector.load %arg6[%c0_31, %c0_32] : memref<32x8xf32, #tpu.memory_space<vmem>>, vector<32x8xf32>
    %cst_33 = arith.constant dense<0.000000e+00> : vector<64x8xf32>
    %176 = tpu.matmul %174, %175, %cst_33 {dimension_numbers = #tpu.dot_dimension_numbers<[1], [0], [0], [1], [0, 0, 1, 1], [], []>} : vector<64x32xf32>, vector<32x8xf32>, vector<64x8xf32> -> vector<64x8xf32>
    %c0_34 = arith.constant 0 : index
    %c0_35 = arith.constant 0 : index
    %177 = vector.load %arg7[%c0_34, %c0_35] : memref<1x8xf32, #tpu.memory_space<vmem>>, vector<1x8xf32>
    %178 = vector.broadcast %177 : vector<1x8xf32> to vector<64x8xf32>
    %179 = arith.addf %176, %178 : vector<64x8xf32>
    %c0_36 = arith.constant 0 : index
    %c0_37 = arith.constant 0 : index
    %180 = vector.load %arg8[%c0_36, %c0_37] : memref<64x8xf32, #tpu.memory_space<vmem>>, vector<64x8xf32>
    tpu.vector_store %arg8[%c0_36, %c0_37], %179 {strides = array<i32>} : memref<64x8xf32, #tpu.memory_space<vmem>>, vector<64x8xf32>,
    return
  }
}

</mosaic_0001>

<bundles_post_ra>
// kernel: tpu_custom_call.1
= control target key start
LH: loop header
LB: loop body
LE: loop exit
PB: predicated region body
PF: predicated region fallthrough
CT: control target
= control target key end

     0   :  { %v1737_v3 = vmov 0.0   ;;  %vm53_vm0 = vcmask 130048   ;;  %v43_v45 = vlaneseq  ;;  %vm216_vm2 = vcmask 523264   ;;  %s2182_s1 = inlined_call_operand.vmem [shape: f32[16,256], index: 1, kind: input, shape index: {}]   ;;  %s2183_s2 = inlined_call_operand.vmem [shape: f32[64,256], index: 2, kind: input, shape index: {}]   ;;  %s2184_s0 = inlined_call_operand.vmem [shape: f32[64,16], index: 0, kind: input, shape index: {}]   ;;  %s2185_s3 = inlined_call_operand.vmem [shape: f32[1,256], index: 3, kind: input, shape index: {}]   ;;  %s2186_s4 = inlined_call_operand.vmem [shape: f32[64,32], index: 4, kind: input, shape index: {}]   ;;  %s2187_s6 = inlined_call_operand.vmem [shape: f32[32,8], index: 6, kind: input, shape index: {}]   ;;  %s2188_s5 = inlined_call_operand.vmem [shape: f32[1,32], index: 5, kind: input, shape index: {}]   ;;  %s2189_s7 = inlined_call_operand.vmem [shape: f32[1,8], index: 7, kind: input, shape index: {}]   ;;  %s2190_s8 = inlined_call_operand.vmem [shape: f32[64,8], index: 8, kind: output, shape index: {}]  }
   0x1   :  { %v38_v0 = vld [vmem:[%s2182_s1 + $0x8] sm:$0xff]  ;;  %v40_v1 = vld [vmem:[%s2182_s1 + $0x18] sm:$0xff]  ;;  %v37_v2 = vld [vmem:[%s2182_s1] sm:$0xff]  ;;  %142 = vmatprep.mubr.f32.mxu1 %v1737_v3  ;;  %490 = vmatprep.mubr.f32.mxu0 %v1737_v3  ;;  %vm1183_vm3 = vcmask 261120   ;;  %vm1313_vm4 = vcmask 64512  }
   0x2   :  { %v1451_v4 = vpack.c.bf16 %v40_v1, %v38_v0  ;;  %v39_v5 = vld [vmem:[%s2182_s1 + $0x10] sm:$0xff]  ;;  %v192_v6 = vld [vmem:[%s2183_s2 + $0x8] sm:$0xff]  ;;  %v194_v8 = vld [vmem:[%s2183_s2 + $0x18] sm:$0xff]  ;;  %v44_v48 = vshrl.u32 %v43_v45, 7 }
   0x3   :  { %v1453_v7 = vpack.c.bf16 %v39_v5, %v37_v2  ;;  %v191_v9 = vld [vmem:[%s2183_s2] sm:$0xff]  ;;  %v193_v10 = vld [vmem:[%s2183_s2 + $0x10] sm:$0xff]  ;;  %v1810_v11 = vpack.c.bf16 %v194_v8, %v192_v6  ;;  %v196_v12 = vld [vmem:[%s2183_s2 + $0x28] sm:$0xff]  ;;  %v208_v5 = vand.u32 127, %v43_v45 }
   0x4   :  { %1452 = vmatprep.subr.bf16.mxu1 %v1451_v4  ;;  %v29_v13 = vld [vmem:[%s2184_s0] sm:$0xff]  ;;  %v1818_v14 = vpack.c.bf16 %v193_v10, %v191_v9  ;;  %v198_v15 = vld [vmem:[%s2183_s2 + $0x38] sm:$0xff]  ;;  %v197_v18 = vld [vmem:[%s2183_s2 + $0x30] sm:$0xff]  ;;  %v45_v51 = vsub.s32 0, %v44_v48  ;;  %v49_v53 = vsub.s32 1, %v44_v48 }
   0x5   :  { %1454 = vmatpush1.bf16.msra.mxu1 %v1453_v7  ;;  %v1824_v16 = vpack.c.bf16 %v198_v15, %v196_v12  ;;  %v195_v17 = vld [vmem:[%s2183_s2 + $0x20] sm:$0xff]  ;;  %1488 = vmatprep.subr.bf16.mxu0 %v1810_v11  ;;  %v200_v19 = vld [vmem:[%s2183_s2 + $0x48] sm:$0xff]  ;;  %v202_v20 = vld [vmem:[%s2183_s2 + $0x58] sm:$0xff]  ;;  %v1962_v6 = vadd.s32 128, %v208_v5 }
   0x6   :  { %1456 = vmatprep.subr.bf16.mxu1 %v1810_v11  ;;  %1490 = vmatpush1.bf16.msra.mxu0 %v1818_v14  ;;  %v30_v21 = vld [vmem:[%s2184_s0 + $0x8] sm:$0xff]  ;;  %v1847_v22 = vpack.c.bf16 %v197_v18, %v195_v17  ;;  %v1850_v23 = vpack.c.bf16 %v202_v20, %v200_v19  ;;  %v199_v24 = vld [vmem:[%s2183_s2 + $0x40] sm:$0xff]  ;;  %v201_v25 = vld [vmem:[%s2183_s2 + $0x50] sm:$0xff] }
   0x7   :  { %1492 = vmatprep.subr.bf16.mxu0 %v1824_v16  ;;  %v204_v26 = vld [vmem:[%s2183_s2 + $0x68] sm:$0xff]  ;;  %v206_v27 = vld [vmem:[%s2183_s2 + $0x78] sm:$0xff]  ;;  %v31_v28 = vld [vmem:[%s2184_s0 + $0x10] sm:$0xff]  ;;  %v1872_v29 = vpack.c.bf16 %v201_v25, %v199_v24  ;;  %vm213_vm1 = vcmp.lt.s32.totalorder %v1962_v6, 192 }
   0x8   :  { %1326 = vmatmul.mubr.msk.f32.vlgmr.msra.gmra.mrb[0].mxu1 %vm53_vm0, %v29_v13  ;;  %v1875_v30 = vpack.c.bf16 %v206_v27, %v204_v26  ;;  %v203_v31 = vld [vmem:[%s2183_s2 + $0x60] sm:$0xff]  ;;  %v205_v32 = vld [vmem:[%s2183_s2 + $0x70] sm:$0xff]  ;;  %v32_v33 = vld [vmem:[%s2184_s0 + $0x18] sm:$0xff] }
   0x9   :  { %1458 = vmatpush1.bf16.msra.mxu1 %v1818_v14  ;;  %148 = vmatprep.mubr.f32.mxu1 %v1737_v3  ;;  %v1891_v34 = vpack.c.bf16 %v205_v32, %v203_v31  ;;  %v33_v35 = vld [vmem:[%s2184_s0 + $0x20] sm:$0xff]  ;;  %v34_v36 = vld [vmem:[%s2184_s0 + $0x28] sm:$0xff]  ;;  %v35_v37 = vld [vmem:[%s2184_s0 + $0x30] sm:$0xff] }
   0xa   :  { %1460 = vmatprep.subr.bf16.mxu1 %v1824_v16  ;;  %1494 = vmatpush1.bf16.msra.mxu0 %v1847_v22  ;;  %v36_v38 = vld [vmem:[%s2184_s0 + $0x38] sm:$0xff]  ;;  %v41_v52 = vld [vmem:[%s2185_s3] sm:$0x3]  ;;  %s1738_s3 = smov 64   ;;  %v1174_v6 = vld [vmem:[%s2187_s6 + $0x10] sm:$0xff] }
   0xb   :  { %1496 = vmatprep.subr.bf16.mxu0 %v1850_v23  ;;  %v1956_v56 = vrot.slane %v41_v52, %v45_v51  ;;  %v1958_v57 = vrot.slane %v41_v52, %v49_v53  ;;  %v1039_v51 = vld [vmem:[%s2186_s4] sm:$0xff]  ;;  %v1040_v52 = vld [vmem:[%s2186_s4 + $0x8] sm:$0xff]  ;;  %v1041_v53 = vld [vmem:[%s2186_s4 + $0x10] sm:$0xff] }
   0xc   :  { %1327 = vmatmul.mubr.msk.f32.gmra.mrb[2].mxu1 %vm53_vm0, %v30_v21 }
   0xd   :  { %154 = vmatprep.mubr.f32.mxu1 %v1737_v3  ;;  %1462 = vmatpush1.bf16.msra.mxu1 %v1847_v22 }
   0xe   :  { %1464 = vmatprep.subr.bf16.mxu1 %v1850_v23  ;;  %1498 = vmatpush1.bf16.msra.mxu0 %v1872_v29 }
   0xf   :  { %1500 = vmatprep.subr.bf16.mxu0 %v1875_v30 }
  0x10   :  { %1328 = vmatmul.mubr.msk.f32.gmra.mrb[4].mxu1 %vm53_vm0, %v31_v28 }
  0x11   :  { %160 = vmatprep.mubr.f32.mxu1 %v1737_v3  ;;  %1466 = vmatpush1.bf16.msra.mxu1 %v1872_v29 }
  0x12   :  { %1468 = vmatprep.subr.bf16.mxu1 %v1875_v30  ;;  %1502 = vmatpush1.bf16.msra.mxu0 %v1891_v34 }
  0x13   :  { %1504 = vmatprep.subr.bf16.mxu0 %v1810_v11 }
  0x14   :  { %1329 = vmatmul.mubr.msk.f32.gmra.mrb[6].mxu1 %vm53_vm0, %v32_v33 }
  0x15   :  { %166 = vmatprep.mubr.f32.mxu1 %v1737_v3  ;;  %1470 = vmatpush1.bf16.msra.mxu1 %v1891_v34 }
  0x16   :  { %1472 = vmatprep.subr.bf16.mxu1 %v1810_v11 }
  0x18   :  { %1330 = vmatmul.mubr.msk.f32.gmra.mrb[8].mxu1 %vm53_vm0, %v33_v35 }
  0x19   :  { %172 = vmatprep.mubr.f32.mxu1 %v1737_v3 }
  0x1c   :  { %1331 = vmatmul.mubr.msk.f32.gmra.mrb[10].mxu1 %vm53_vm0, %v34_v36 }
  0x1d   :  { %178 = vmatprep.mubr.f32.mxu1 %v1737_v3 }
  0x20   :  { %1332 = vmatmul.mubr.msk.f32.gmra.mrb[12].mxu1 %vm53_vm0, %v35_v37 }
  0x21   :  { %184 = vmatprep.mubr.f32.mxu1 %v1737_v3 }
  0x24   :  { %1333 = vmatmul.mubr.msk.f32.gmra.mrb[14].mxu1 %vm53_vm0, %v36_v38 }
  0x25   :  { %284 = vmatprep.mubr.f32.mxu1 %v1737_v3 }
  0x28   :  { %285 = vmatmul.mubr.f32.vlgmr.msra.gmra.mrb[0].mxu1 %v1737_v3 }
  0x29   :  { %1474 = vmatpush1.bf16.msra.mxu1 %v1818_v14  ;;  %387 = vmatprep.mubr.f32.mxu1 %v1737_v3 }
  0x2a   :  { %1476 = vmatprep.subr.bf16.mxu1 %v1824_v16 }
  0x2d   :  { %1478 = vmatpush1.bf16.msra.mxu1 %v1847_v22 }
  0x2e   :  { %1480 = vmatprep.subr.bf16.mxu1 %v1850_v23 }
  0x31   :  { %1482 = vmatpush1.bf16.msra.mxu1 %v1872_v29 }
  0x32   :  { %1484 = vmatprep.subr.bf16.mxu1 %v1875_v30 }
  0x35   :  { %1486 = vmatpush1.bf16.msra.mxu1 %v1891_v34 }
  0xe3   :  { %v1929_v39 = vpop.f32.mrb[4].mxu1 }
  0xe4   :  { %v1931_v40 = vpop.f32.mrb[5].mxu1 }
  0xe7   :  { %v1933_v41 = vpop.f32.mrb[6].mxu1 }
  0xe8   :  { %v1935_v42 = vpop.f32.mrb[7].mxu1 }
  0xeb   :  { %v1937_v43 = vpop.f32.mrb[8].mxu1 }
  0xec   :  { %v1939_v44 = vpop.f32.mrb[9].mxu1 }
  0xef   :  { %v1941_v46 = vpop.f32.mrb[10].mxu1 }
  0xf0   :  { %v1943_v47 = vpop.f32.mrb[11].mxu1 }
  0xf3   :  { %v1945_v49 = vpop.f32.mrb[12].mxu1 }
  0xf4   :  { %v1947_v50 = vpop.f32.mrb[13].mxu1 }
  0xf7   :  { %v1952_v54 = vpop.f32.mrb[14].mxu1 }
  0xf8   :  { %v1954_v55 = vpop.f32.mrb[15].mxu1 }
  0xfb   :  { %v286_v58 = vpop.f32.mrb[0].mxu1 }
  0xfc   :  { %v1607_v59 = vadd.f32 %v286_v58, %v1956_v56  ;;  %v288_v60 = vpop.f32.mrb[1].mxu1  ;;  %v1583_v58 = vpack.c.bf16 %v1040_v52, %v1039_v51  ;;  %v163_v52 = vadd.f32 %v1933_v41, %v1956_v56 }
  0xfd   :  { %v1608_v61 = vadd.f32 %v288_v60, %v1958_v57 }
  0xfe   :  { %v1334_v62 = vmul.f32 -1.442695, %v1607_v59  ;;  %v1042_v59 = vld [vmem:[%s2186_s4 + $0x18] sm:$0xff]  ;;  %1584 = vmatprep.subr.bf16.mxu1 %v1583_v58 }
  0xff   :  { %v1335_v63 = vmul.f32 -1.442695, %v1608_v61  ;;  %v1587_v60 = vpack.c.bf16 %v1042_v59, %v1041_v53  ;;  %v165_v53 = vadd.f32 %v1935_v42, %v1958_v57 }
 0x100   :  { %1641 = vpow2.f32 %v1334_v62  ;;  %v1044_v62 = vld [vmem:[%s2186_s4 + $0x28] sm:$0xff] }
 0x101   :  { %1643 = vpow2.f32 %v1335_v63 }
 0x102   :  { %1645 = vtanh.f32 %v1608_v61  ;;  %v1043_v61 = vld [vmem:[%s2186_s4 + $0x20] sm:$0xff] }
 0x103   :  { %v1591_v63 = vpack.c.bf16 %v1044_v62, %v1043_v61 }
 0x10a   :  { %v1642_v0 = vpop.eup %1641 }
 0x10b   :  { %v1644_v1 = vpop.eup %1643  ;;  %v301_v2 = vadd.f32 1.0, %v1642_v0  ;;  %v1045_v0 = vld [vmem:[%s2186_s4 + $0x30] sm:$0xff] }
 0x10c   :  { %v302_v4 = vadd.f32 1.0, %v1644_v1  ;;  %v1646_v7 = vpop.eup %1645  ;;  %v1046_v1 = vld [vmem:[%s2186_s4 + $0x38] sm:$0xff] }
 0x10e   :  { %1647 = vrcp.f32 %v302_v4 }
 0x10f   :  { %1649 = vrcp.f32 %v301_v2  ;;  %v1595_v2 = vpack.c.bf16 %v1046_v1, %v1045_v0 }
 0x118   :  { %v1648_v8 = vpop.eup %1647 }
 0x119   :  { %v1650_v9 = vpop.eup %1649  ;;  %v308_v10 = vsel %vm213_vm1, %v1646_v7, %v1648_v8 }
 0x11a   :  { %v310_v12 = vmul.f32 %v1650_v9, %v308_v10  ;;  %v309_v13 = vmul.f32 0.0, %v1650_v9 }
 0x11c   :  { %312 = vrot.lane.b32.xlu0 %v310_v12, %s1738_s3  ;;  %v157_v12 = vadd.f32 %v1929_v39, %v1956_v56 }
 0x18e   :  { %v313_v15 = vpop.permute.xlu0 %312 }
 0x18f   :  { %v315_v17 = vadd.f32 %v313_v15, %v309_v13  ;;  %v159_v13 = vadd.f32 %v1931_v40, %v1958_v57 }
 0x191   :  { %1651 = vtanh.f32 %v315_v17 }
 0x19b   :  { %v1652_v18 = vpop.eup %1651 }
 0x19c   :  { %v317_v19 = vmul.f32 %v1652_v18, %v308_v10 }
 0x19e   :  { %319 = vrot.lane.b32.xlu0 %v317_v19, %s1738_s3 }
 0x210   :  { %v320_v20 = vpop.permute.xlu0 %319 }
 0x211   :  { %1336 = vmatmul.mubr.msk.f32.vlgmr.msra.gmra.mrb[2].mxu1 %vm216_vm2, %v320_v20 }
 0x212   :  { %1419 = vmatprep.mubr.msk.f32.mxu1 %vm216_vm2, %v320_v20  ;;  %1586 = vmatpush3.bf16.msra.mxu1 %v1583_v58 }
 0x213   :  { %1588 = vmatprep.subr.bf16.mxu1 %v1587_v60 }
 0x216   :  { %1590 = vmatpush3.bf16.msra.mxu1 %v1587_v60 }
 0x217   :  { %1592 = vmatprep.subr.bf16.mxu1 %v1591_v63 }
 0x21a   :  { %1594 = vmatpush3.bf16.msra.mxu1 %v1591_v63 }
 0x21b   :  { %1596 = vmatprep.subr.bf16.mxu1 %v1595_v2 }
 0x21e   :  { %1598 = vmatpush3.bf16.msra.mxu1 %v1595_v2 }
 0x2e4   :  { %v389_v21 = vpop.f32.mrb[2].mxu1 }
 0x2e5   :  { %v1609_v24 = vadd.f32 %v389_v21, %v1956_v56  ;;  %v391_v25 = vpop.f32.mrb[3].mxu1 }
 0x2e6   :  { %v1610_v26 = vadd.f32 %v391_v25, %v1958_v57 }
 0x2e7   :  { %v1337_v27 = vmul.f32 -1.442695, %v1609_v24 }
 0x2e8   :  { %v1338_v28 = vmul.f32 -1.442695, %v1610_v26 }
 0x2e9   :  { %1653 = vpow2.f32 %v1337_v27 }
 0x2ea   :  { %1655 = vpow2.f32 %v1338_v28 }
 0x2eb   :  { %1657 = vtanh.f32 %v1610_v26 }
 0x2f3   :  { %v1654_v31 = vpop.eup %1653 }
 0x2f4   :  { %v1656_v32 = vpop.eup %1655  ;;  %v404_v33 = vadd.f32 1.0, %v1654_v31 }
 0x2f5   :  { %v405_v35 = vadd.f32 1.0, %v1656_v32  ;;  %v1658_v36 = vpop.eup %1657 }
 0x2f7   :  { %1659 = vrcp.f32 %v405_v35 }
 0x2f8   :  { %1661 = vrcp.f32 %v404_v33 }
 0x301   :  { %v1660_v37 = vpop.eup %1659 }
 0x302   :  { %v1662_v38 = vpop.eup %1661  ;;  %v411_v45 = vsel %vm213_vm1, %v1658_v36, %v1660_v37 }
 0x303   :  { %v413_v48 = vmul.f32 %v1662_v38, %v411_v45  ;;  %v412_v4 = vmul.f32 %v1662_v38, %v315_v17 }
 0x305   :  { %415 = vrot.lane.b32.xlu1 %v413_v48, %s1738_s3 }
 0x377   :  { %v416_v5 = vpop.permute.xlu1 %415 }
 0x378   :  { %v418_v7 = vadd.f32 %v416_v5, %v412_v4 }
 0x37a   :  { %1663 = vtanh.f32 %v418_v7 }
 0x384   :  { %v1664_v8 = vpop.eup %1663 }
 0x385   :  { %v420_v9 = vmul.f32 %v1664_v8, %v411_v45 }
 0x387   :  { %422 = vrot.lane.b32.xlu1 %v420_v9, %s1738_s3 }
 0x3f9   :  { %v423_v10 = vpop.permute.xlu1 %422 }
 0x3fa   :  { %1339 = vmatmul.mubr.msk.f32.vlgmr.msra.gmra.mrb[0].mxu0 %vm216_vm2, %v423_v10  ;;  %1420 = vmatmul.mubr.msk.f32.vlgmr.msra.gmra.mrb[16].mxu1 %vm216_vm2, %v423_v10 }
 0x3fb   :  { %1506 = vmatpush1.bf16.msra.mxu0 %v1818_v14  ;;  %593 = vmatprep.mubr.f32.mxu0 %v1737_v3 }
 0x3fc   :  { %1508 = vmatprep.subr.bf16.mxu0 %v1824_v16 }
 0x3ff   :  { %1510 = vmatpush1.bf16.msra.mxu0 %v1847_v22 }
 0x400   :  { %1512 = vmatprep.subr.bf16.mxu0 %v1850_v23 }
 0x403   :  { %1514 = vmatpush1.bf16.msra.mxu0 %v1872_v29 }
 0x404   :  { %1516 = vmatprep.subr.bf16.mxu0 %v1875_v30 }
 0x407   :  { %1518 = vmatpush1.bf16.msra.mxu0 %v1891_v34 }
 0x408   :  { %1520 = vmatprep.subr.bf16.mxu0 %v1810_v11 }
 0x4cd   :  { %v492_v15 = vpop.f32.mrb[0].mxu0  ;;  %v2016_v17 = vpop.f32.mrb[16].mxu1 }
 0x4ce   :  { %v497_v18 = vadd.f32 %v492_v15, %v157_v12  ;;  %v494_v19 = vpop.f32.mrb[1].mxu0  ;;  %v2018_v20 = vpop.f32.mrb[17].mxu1 }
 0x4cf   :  { %v498_v21 = vadd.f32 %v494_v19, %v159_v13  ;;  %v169_v19 = vadd.f32 %v1937_v43, %v1956_v56 }
 0x4d0   :  { %v1340_v24 = vmul.f32 -1.442695, %v497_v18 }
 0x4d1   :  { %v1341_v25 = vmul.f32 -1.442695, %v498_v21 }
 0x4d2   :  { %1665 = vpow2.f32 %v1340_v24 }
 0x4d3   :  { %1667 = vpow2.f32 %v1341_v25 }
 0x4d4   :  { %1669 = vtanh.f32 %v498_v21  ;;  %v171_v21 = vadd.f32 %v1939_v44, %v1958_v57 }
 0x4dc   :  { %v1666_v26 = vpop.eup %1665 }
 0x4dd   :  { %v1668_v27 = vpop.eup %1667  ;;  %v507_v28 = vadd.f32 1.0, %v1666_v26 }
 0x4de   :  { %v508_v31 = vadd.f32 1.0, %v1668_v27  ;;  %v1670_v39 = vpop.eup %1669 }
 0x4e0   :  { %1671 = vrcp.f32 %v508_v31 }
 0x4e1   :  { %1673 = vrcp.f32 %v507_v28 }
 0x4ea   :  { %v1672_v40 = vpop.eup %1671 }
 0x4eb   :  { %v1674_v32 = vpop.eup %1673  ;;  %v514_v33 = vsel %vm213_vm1, %v1670_v39, %v1672_v40 }
 0x4ec   :  { %v516_v35 = vmul.f32 %v1674_v32, %v514_v33  ;;  %v515_v36 = vmul.f32 %v1674_v32, %v418_v7 }
 0x4ee   :  { %518 = vrot.lane.b32.xlu0 %v516_v35, %s1738_s3 }
 0x560   :  { %v519_v37 = vpop.permute.xlu0 %518 }
 0x561   :  { %v521_v38 = vadd.f32 %v519_v37, %v515_v36 }
 0x563   :  { %1675 = vtanh.f32 %v521_v38 }
 0x56d   :  { %v1676_v45 = vpop.eup %1675 }
 0x56e   :  { %v523_v48 = vmul.f32 %v1676_v45, %v514_v33 }
 0x570   :  { %525 = vrot.lane.b32.xlu1 %v523_v48, %s1738_s3 }
 0x5e2   :  { %v526_v51 = vpop.permute.xlu1 %525 }
 0x5e3   :  { %1342 = vmatmul.mubr.msk.f32.vlgmr.msra.gmra.mrb[2].mxu0 %vm216_vm2, %v526_v51  ;;  %1422 = vmatprep.mubr.msk.f32.mxu1 %vm216_vm2, %v526_v51 }
 0x5e4   :  { %1522 = vmatpush1.bf16.msra.mxu0 %v1818_v14  ;;  %696 = vmatprep.mubr.f32.mxu0 %v1737_v3 }
 0x5e5   :  { %1524 = vmatprep.subr.bf16.mxu0 %v1824_v16 }
 0x5e8   :  { %1526 = vmatpush1.bf16.msra.mxu0 %v1847_v22 }
 0x5e9   :  { %1528 = vmatprep.subr.bf16.mxu0 %v1850_v23 }
 0x5ec   :  { %1530 = vmatpush1.bf16.msra.mxu0 %v1872_v29 }
 0x5ed   :  { %1532 = vmatprep.subr.bf16.mxu0 %v1875_v30 }
 0x5f0   :  { %1534 = vmatpush1.bf16.msra.mxu0 %v1891_v34 }
 0x5f1   :  { %1536 = vmatprep.subr.bf16.mxu0 %v1810_v11 }
 0x6b6   :  { %v595_v58 = vpop.f32.mrb[2].mxu0 }
 0x6b7   :  { %v600_v59 = vadd.f32 %v595_v58, %v163_v52  ;;  %v597_v60 = vpop.f32.mrb[3].mxu0 }
 0x6b8   :  { %v601_v61 = vadd.f32 %v597_v60, %v165_v53  ;;  %v175_v60 = vadd.f32 %v1941_v46, %v1956_v56 }
 0x6b9   :  { %v1343_v62 = vmul.f32 -1.442695, %v600_v59 }
 0x6ba   :  { %v1344_v63 = vmul.f32 -1.442695, %v601_v61 }
 0x6bb   :  { %1677 = vpow2.f32 %v1343_v62 }
 0x6bc   :  { %1679 = vpow2.f32 %v1344_v63 }
 0x6bd   :  { %1681 = vtanh.f32 %v601_v61  ;;  %v177_v61 = vadd.f32 %v1943_v47, %v1958_v57 }
 0x6c5   :  { %v1678_v0 = vpop.eup %1677 }
 0x6c6   :  { %v1680_v1 = vpop.eup %1679  ;;  %v610_v2 = vadd.f32 1.0, %v1678_v0 }
 0x6c7   :  { %v611_v4 = vadd.f32 1.0, %v1680_v1  ;;  %v1682_v5 = vpop.eup %1681 }
 0x6c9   :  { %1683 = vrcp.f32 %v611_v4 }
 0x6ca   :  { %1685 = vrcp.f32 %v610_v2 }
 0x6d3   :  { %v1684_v41 = vpop.eup %1683 }
 0x6d4   :  { %v1686_v7 = vpop.eup %1685  ;;  %v617_v42 = vsel %vm213_vm1, %v1682_v5, %v1684_v41 }
 0x6d5   :  { %v619_v8 = vmul.f32 %v1686_v7, %v617_v42  ;;  %v618_v9 = vmul.f32 %v1686_v7, %v521_v38 }
 0x6d7   :  { %621 = vrot.lane.b32.xlu0 %v619_v8, %s1738_s3 }
 0x749   :  { %v622_v10 = vpop.permute.xlu0 %621 }
 0x74a   :  { %v624_v12 = vadd.f32 %v622_v10, %v618_v9 }
 0x74c   :  { %1687 = vtanh.f32 %v624_v12 }
 0x756   :  { %v1688_v13 = vpop.eup %1687 }
 0x757   :  { %v626_v15 = vmul.f32 %v1688_v13, %v617_v42 }
 0x759   :  { %628 = vrot.lane.b32.xlu1 %v626_v15, %s1738_s3 }
 0x7cb   :  { %v629_v18 = vpop.permute.xlu1 %628 }
 0x7cc   :  { %1345 = vmatmul.mubr.msk.f32.vlgmr.msra.gmra.mrb[4].mxu0 %vm216_vm2, %v629_v18  ;;  %1423 = vmatmul.mubr.msk.f32.gmra.mrb[18].mxu1 %vm216_vm2, %v629_v18 }
 0x7cd   :  { %1538 = vmatpush1.bf16.msra.mxu0 %v1818_v14  ;;  %799 = vmatprep.mubr.f32.mxu0 %v1737_v3 }
 0x7ce   :  { %1540 = vmatprep.subr.bf16.mxu0 %v1824_v16 }
 0x7d1   :  { %1542 = vmatpush1.bf16.msra.mxu0 %v1847_v22 }
 0x7d2   :  { %1544 = vmatprep.subr.bf16.mxu0 %v1850_v23 }
 0x7d5   :  { %1546 = vmatpush1.bf16.msra.mxu0 %v1872_v29 }
 0x7d6   :  { %1548 = vmatprep.subr.bf16.mxu0 %v1875_v30 }
 0x7d9   :  { %1550 = vmatpush1.bf16.msra.mxu0 %v1891_v34 }
 0x7da   :  { %1552 = vmatprep.subr.bf16.mxu0 %v1810_v11 }
 0x89f   :  { %v698_v24 = vpop.f32.mrb[4].mxu0  ;;  %v2058_v25 = vpop.f32.mrb[18].mxu1 }
 0x8a0   :  { %v703_v26 = vadd.f32 %v698_v24, %v169_v19  ;;  %v700_v27 = vpop.f32.mrb[5].mxu0  ;;  %v2060_v28 = vpop.f32.mrb[19].mxu1 }
 0x8a1   :  { %v704_v31 = vadd.f32 %v700_v27, %v171_v21  ;;  %v181_v21 = vadd.f32 %v1945_v49, %v1956_v56 }
 0x8a2   :  { %v1346_v39 = vmul.f32 -1.442695, %v703_v26 }
 0x8a3   :  { %v1347_v40 = vmul.f32 -1.442695, %v704_v31 }
 0x8a4   :  { %1689 = vpow2.f32 %v1346_v39 }
 0x8a5   :  { %1691 = vpow2.f32 %v1347_v40 }
 0x8a6   :  { %1693 = vtanh.f32 %v704_v31 }
 0x8ae   :  { %v1690_v32 = vpop.eup %1689 }
 0x8af   :  { %v1692_v33 = vpop.eup %1691  ;;  %v713_v35 = vadd.f32 1.0, %v1690_v32 }
 0x8b0   :  { %v714_v36 = vadd.f32 1.0, %v1692_v33  ;;  %v1694_v43 = vpop.eup %1693 }
 0x8b2   :  { %1695 = vrcp.f32 %v714_v36 }
 0x8b3   :  { %1697 = vrcp.f32 %v713_v35 }
 0x8bc   :  { %v1696_v44 = vpop.eup %1695 }
 0x8bd   :  { %v1698_v37 = vpop.eup %1697  ;;  %v720_v38 = vsel %vm213_vm1, %v1694_v43, %v1696_v44 }
 0x8be   :  { %v722_v45 = vmul.f32 %v1698_v37, %v720_v38  ;;  %v721_v48 = vmul.f32 %v1698_v37, %v624_v12 }
 0x8c0   :  { %724 = vrot.lane.b32.xlu0 %v722_v45, %s1738_s3  ;;  %v187_v45 = vadd.f32 %v1952_v54, %v1956_v56 }
 0x932   :  { %v725_v51 = vpop.permute.xlu0 %724 }
 0x933   :  { %v727_v52 = vadd.f32 %v725_v51, %v721_v48  ;;  %v189_v48 = vadd.f32 %v1954_v55, %v1958_v57 }
 0x935   :  { %1699 = vtanh.f32 %v727_v52 }
 0x93f   :  { %v1700_v53 = vpop.eup %1699 }
 0x940   :  { %v729_v58 = vmul.f32 %v1700_v53, %v720_v38 }
 0x942   :  { %731 = vrot.lane.b32.xlu1 %v729_v58, %s1738_s3 }
 0x9b4   :  { %v732_v59 = vpop.permute.xlu1 %731 }
 0x9b5   :  { %1348 = vmatmul.mubr.msk.f32.vlgmr.msra.gmra.mrb[6].mxu0 %vm216_vm2, %v732_v59  ;;  %1425 = vmatprep.mubr.msk.f32.mxu1 %vm216_vm2, %v732_v59 }
 0x9b6   :  { %1554 = vmatpush1.bf16.msra.mxu0 %v1818_v14  ;;  %902 = vmatprep.mubr.f32.mxu0 %v1737_v3 }
 0x9b7   :  { %1556 = vmatprep.subr.bf16.mxu0 %v1824_v16 }
 0x9ba   :  { %1558 = vmatpush1.bf16.msra.mxu0 %v1847_v22 }
 0x9bb   :  { %1560 = vmatprep.subr.bf16.mxu0 %v1850_v23 }
 0x9be   :  { %1562 = vmatpush1.bf16.msra.mxu0 %v1872_v29 }
 0x9bf   :  { %1564 = vmatprep.subr.bf16.mxu0 %v1875_v30 }
 0x9c2   :  { %1566 = vmatpush1.bf16.msra.mxu0 %v1891_v34 }
 0x9c3   :  { %1568 = vmatprep.subr.bf16.mxu0 %v1810_v11 }
 0xa88   :  { %v801_v62 = vpop.f32.mrb[6].mxu0 }
 0xa89   :  { %v806_v63 = vadd.f32 %v801_v62, %v175_v60  ;;  %v803_v0 = vpop.f32.mrb[7].mxu0 }
 0xa8a   :  { %v807_v1 = vadd.f32 %v803_v0, %v177_v61 }
 0xa8b   :  { %v1349_v2 = vmul.f32 -1.442695, %v806_v63 }
 0xa8c   :  { %v1350_v4 = vmul.f32 -1.442695, %v807_v1 }
 0xa8d   :  { %1701 = vpow2.f32 %v1349_v2  ;;  %v1172_v2 = vld [vmem:[%s2187_s6] sm:$0xff] }
 0xa8e   :  { %1703 = vpow2.f32 %v1350_v4  ;;  %v1173_v4 = vld [vmem:[%s2187_s6 + $0x8] sm:$0xff] }
 0xa8f   :  { %1705 = vtanh.f32 %v807_v1 }
 0xa97   :  { %v1702_v5 = vpop.eup %1701 }
 0xa98   :  { %v1704_v41 = vpop.eup %1703  ;;  %v816_v7 = vadd.f32 1.0, %v1702_v5  ;;  %v1599_v5 = vpack.c.bf16 %v1173_v4, %v1172_v2 }
 0xa99   :  { %v817_v42 = vadd.f32 1.0, %v1704_v41  ;;  %v1706_v11 = vpop.eup %1705 }
 0xa9a   :  { %1600 = vmatprep.subr.bf16.mxu1 %v1599_v5 }
 0xa9b   :  { %1707 = vrcp.f32 %v817_v42  ;;  %1602 = vmatpush3.bf16.msra.mxu1 %v1599_v5  ;;  %v1175_v42 = vld [vmem:[%s2187_s6 + $0x18] sm:$0xff] }
 0xa9c   :  { %1709 = vrcp.f32 %v816_v7 }
 0xaa5   :  { %v1708_v46 = vpop.eup %1707 }
 0xaa6   :  { %v1710_v8 = vpop.eup %1709  ;;  %v823_v47 = vsel %vm213_vm1, %v1706_v11, %v1708_v46  ;;  %v1603_v46 = vpack.c.bf16 %v1175_v42, %v1174_v6 }
 0xaa7   :  { %v825_v9 = vmul.f32 %v1710_v8, %v823_v47  ;;  %v824_v10 = vmul.f32 %v1710_v8, %v727_v52 }
 0xaa8   :  { %1604 = vmatprep.subr.bf16.mxu1 %v1603_v46 }
 0xaa9   :  { %827 = vrot.lane.b32.xlu0 %v825_v9, %s1738_s3  ;;  %1606 = vmatpush3.bf16.msra.mxu1 %v1603_v46  ;;  %v1357_v9 = vld [vmem:[%s2188_s5] ss:$0 sm:$0xff] }
 0xb1b   :  { %v828_v12 = vpop.permute.xlu0 %827 }
 0xb1c   :  { %v830_v13 = vadd.f32 %v828_v12, %v824_v10  ;;  %v1126_v10 = vadd.f32 %v1357_v9, %v2018_v20  ;;  %v1131_v12 = vadd.f32 %v2016_v17, %v1357_v9 }
 0xb1e   :  { %1711 = vtanh.f32 %v830_v13 }
 0xb28   :  { %v1712_v15 = vpop.eup %1711 }
 0xb29   :  { %v832_v18 = vmul.f32 %v1712_v15, %v823_v47  ;;  %v1136_v15 = vadd.f32 %v1357_v9, %v2060_v28 }
 0xb2b   :  { %834 = vrot.lane.b32.xlu1 %v832_v18, %s1738_s3 }
 0xb9d   :  { %v835_v19 = vpop.permute.xlu1 %834 }
 0xb9e   :  { %1351 = vmatmul.mubr.msk.f32.vlgmr.msra.gmra.mrb[8].mxu0 %vm216_vm2, %v835_v19  ;;  %1426 = vmatmul.mubr.msk.f32.gmra.mrb[20].mxu1 %vm216_vm2, %v835_v19  ;;  %v1165_v19 = vmax.f32 %v1131_v12, 0.0 }
 0xb9f   :  { %1570 = vmatpush1.bf16.msra.mxu0 %v1818_v14  ;;  %1005 = vmatprep.mubr.f32.mxu0 %v1737_v3  ;;  %v183_v14 = vadd.f32 %v1947_v50, %v1958_v57 }
 0xba0   :  { %1572 = vmatprep.subr.bf16.mxu0 %v1824_v16 }
 0xba3   :  { %1574 = vmatpush1.bf16.msra.mxu0 %v1847_v22 }
 0xba4   :  { %1576 = vmatprep.subr.bf16.mxu0 %v1850_v23 }
 0xba7   :  { %1578 = vmatpush1.bf16.msra.mxu0 %v1872_v29 }
 0xba8   :  { %1580 = vmatprep.subr.bf16.mxu0 %v1875_v30 }
 0xbab   :  { %1582 = vmatpush1.bf16.msra.mxu0 %v1891_v34 }
 0xc71   :  { %v904_v24 = vpop.f32.mrb[8].mxu0  ;;  %v2099_v3 = vpop.f32.mrb[20].mxu1 }
 0xc72   :  { %v909_v16 = vadd.f32 %v904_v24, %v181_v21  ;;  %v906_v26 = vpop.f32.mrb[9].mxu0  ;;  %v2101_v22 = vpop.f32.mrb[21].mxu1  ;;  %v1141_v21 = vadd.f32 %v2058_v25, %v1357_v9  ;;  %v1151_v20 = vadd.f32 %v2099_v3, %v1357_v9 }
 0xc73   :  { %v910_v23 = vadd.f32 %v906_v26, %v183_v14  ;;  %v1166_v14 = vmax.f32 %v1136_v15, 0.0  ;;  %v1146_v24 = vadd.f32 %v1357_v9, %v2101_v22  ;;  %v1366_v22 = vld [vmem:[%s2189_s7] ss:$0 sm:$0xff] }
 0xc74   :  { %v1352_v27 = vmul.f32 -1.442695, %v909_v16  ;;  %v1167_v17 = vmax.f32 %v1141_v21, 0.0  ;;  %v1169_v28 = vmax.f32 %v1151_v20, 0.0 }
 0xc75   :  { %v1353_v29 = vmul.f32 -1.442695, %v910_v23  ;;  %v1168_v16 = vmax.f32 %v1146_v24, 0.0 }
 0xc76   :  { %1713 = vpow2.f32 %v1352_v27 }
 0xc77   :  { %1715 = vpow2.f32 %v1353_v29 }
 0xc78   :  { %1717 = vtanh.f32 %v910_v23 }
 0xc80   :  { %v1714_v30 = vpop.eup %1713 }
 0xc81   :  { %v1716_v34 = vpop.eup %1715  ;;  %v919_v31 = vadd.f32 1.0, %v1714_v30 }
 0xc82   :  { %v920_v39 = vadd.f32 1.0, %v1716_v34  ;;  %v1718_v49 = vpop.eup %1717 }
 0xc84   :  { %1719 = vrcp.f32 %v920_v39 }
 0xc85   :  { %1721 = vrcp.f32 %v919_v31 }
 0xc8e   :  { %v1720_v50 = vpop.eup %1719 }
 0xc8f   :  { %v1722_v40 = vpop.eup %1721  ;;  %v926_v32 = vsel %vm213_vm1, %v1718_v49, %v1720_v50 }
 0xc90   :  { %v928_v33 = vmul.f32 %v1722_v40, %v926_v32  ;;  %v927_v35 = vmul.f32 %v1722_v40, %v830_v13  ;;  %v1164_v13 = vmax.f32 %v1126_v10, 0.0 }
 0xc92   :  { %930 = vrot.lane.b32.xlu0 %v928_v33, %s1738_s3 }
 0xd04   :  { %v931_v36 = vpop.permute.xlu0 %930 }
 0xd05   :  { %v933_v43 = vadd.f32 %v931_v36, %v927_v35 }
 0xd07   :  { %1723 = vtanh.f32 %v933_v43 }
 0xd11   :  { %v1724_v44 = vpop.eup %1723 }
 0xd12   :  { %v935_v37 = vmul.f32 %v1724_v44, %v926_v32 }
 0xd14   :  { %937 = vrot.lane.b32.xlu1 %v935_v37, %s1738_s3 }
 0xd86   :  { %v938_v38 = vpop.permute.xlu1 %937 }
 0xd87   :  { %1354 = vmatmul.mubr.msk.f32.vlgmr.msra.gmra.mrb[10].mxu0 %vm216_vm2, %v938_v38  ;;  %1428 = vmatprep.mubr.msk.f32.mxu1 %vm216_vm2, %v938_v38 }
 0xe5a   :  { %v1007_v51 = vpop.f32.mrb[10].mxu0 }
 0xe5b   :  { %v1012_v52 = vadd.f32 %v1007_v51, %v187_v45  ;;  %v1009_v53 = vpop.f32.mrb[11].mxu0 }
 0xe5c   :  { %v1013_v58 = vadd.f32 %v1009_v53, %v189_v48 }
 0xe5d   :  { %v1355_v59 = vmul.f32 -1.442695, %v1012_v52 }
 0xe5e   :  { %v1356_v60 = vmul.f32 -1.442695, %v1013_v58 }
 0xe5f   :  { %1725 = vpow2.f32 %v1355_v59 }
 0xe60   :  { %1727 = vpow2.f32 %v1356_v60 }
 0xe61   :  { %1729 = vtanh.f32 %v1013_v58 }
 0xe69   :  { %v1726_v61 = vpop.eup %1725 }
 0xe6a   :  { %v1728_v62 = vpop.eup %1727  ;;  %v1022_v63 = vadd.f32 1.0, %v1726_v61 }
 0xe6b   :  { %v1023_v0 = vadd.f32 1.0, %v1728_v62  ;;  %v1730_v1 = vpop.eup %1729 }
 0xe6d   :  { %1731 = vrcp.f32 %v1023_v0 }
 0xe6e   :  { %1733 = vrcp.f32 %v1022_v63 }
 0xe77   :  { %v1732_v54 = vpop.eup %1731 }
 0xe78   :  { %v1734_v56 = vpop.eup %1733  ;;  %v1029_v55 = vsel %vm213_vm1, %v1730_v1, %v1732_v54 }
 0xe79   :  { %v1031_v57 = vmul.f32 %v1734_v56, %v1029_v55  ;;  %v1030_v41 = vmul.f32 %v1734_v56, %v933_v43 }
 0xe7b   :  { %1033 = vrot.lane.b32.xlu0 %v1031_v57, %s1738_s3 }
 0xeed   :  { %v1034_v7 = vpop.permute.xlu0 %1033 }
 0xeee   :  { %v1036_v11 = vadd.f32 %v1034_v7, %v1030_v41 }
 0xef0   :  { %1735 = vtanh.f32 %v1036_v11 }
 0xefa   :  { %v1736_v8 = vpop.eup %1735 }
 0xefb   :  { %v1038_v47 = vmul.f32 %v1736_v8, %v1029_v55 }
 0xefd   :  { %1055 = vrot.lane.b32.xlu1 %v1038_v47, %s1738_s3 }
 0xf6f   :  { %v1056_v18 = vpop.permute.xlu1 %1055 }
 0xf70   :  { %1429 = vmatmul.mubr.msk.f32.gmra.mrb[22].mxu1 %vm216_vm2, %v1056_v18 }
 0xf71   :  { %1439 = vmatprep.mubr.msk.f32.mxu1 %vm1183_vm3, %v1164_v13 }
 0xf74   :  { %1440 = vmatmul.mubr.msk.f32.vlgmr.msra.gmra.mrb[24].mxu1 %vm1183_vm3, %v1165_v19 }
 0xf75   :  { %1442 = vmatprep.mubr.msk.f32.mxu1 %vm1183_vm3, %v1166_v14 }
 0xf78   :  { %1443 = vmatmul.mubr.msk.f32.gmra.mrb[26].mxu1 %vm1183_vm3, %v1167_v17 }
 0xf79   :  { %1445 = vmatprep.mubr.msk.f32.mxu1 %vm1183_vm3, %v1168_v16 }
 0xf7c   :  { %1446 = vmatmul.mubr.msk.f32.gmra.mrb[28].mxu1 %vm1183_vm3, %v1169_v28 }
0x1043   :  { %v1430_v26 = vpop.f32.mrb[22].mxu1 }
0x1044   :  { %v1161_v25 = vadd.f32 %v1430_v26, %v1357_v9  ;;  %v1155_v23 = vpop.f32.mrb[23].mxu1 }
0x1045   :  { %v1156_v27 = vadd.f32 %v1357_v9, %v1155_v23 }
0x1046   :  { %v1171_v3 = vmax.f32 %v1161_v25, 0.0 }
0x1047   :  { %v1170_v29 = vmax.f32 %v1156_v27, 0.0  ;;  %v1441_v30 = vpop.f32.mrb[24].mxu1 }
0x1048   :  { %v1280_v34 = vadd.f32 %v1441_v30, %v1366_v22  ;;  %v1274_v31 = vpop.f32.mrb[25].mxu1 }
0x1049   :  { %v1275_v39 = vadd.f32 %v1366_v22, %v1274_v31  ;;  %1448 = vmatprep.mubr.msk.f32.mxu1 %vm1183_vm3, %v1170_v29 }
0x104a   :  { %1315 = vst.msk [vmem:[%s2190_s8 + $0x8] sm:$0xff] %vm1313_vm4, %v1280_v34  ;;  %1449 = vmatmul.mubr.msk.f32.gmra.mrb[30].mxu1 %vm1183_vm3, %v1171_v3 }
0x104b   :  { %1314 = vst.msk [vmem:[%s2190_s8] sm:$0xff] %vm1313_vm4, %v1275_v39  ;;  %v1444_v49 = vpop.f32.mrb[26].mxu1 }
0x104c   :  { %v1290_v50 = vadd.f32 %v1444_v49, %v1366_v22  ;;  %v1284_v40 = vpop.f32.mrb[27].mxu1 }
0x104d   :  { %v1285_v32 = vadd.f32 %v1366_v22, %v1284_v40 }
0x104e   :  { %1317 = vst.msk [vmem:[%s2190_s8 + $0x18] sm:$0xff] %vm1313_vm4, %v1290_v50 }
0x104f   :  { %1316 = vst.msk [vmem:[%s2190_s8 + $0x10] sm:$0xff] %vm1313_vm4, %v1285_v32  ;;  %v1447_v33 = vpop.f32.mrb[28].mxu1 }
0x1050   :  { %v1300_v35 = vadd.f32 %v1447_v33, %v1366_v22  ;;  %v1294_v36 = vpop.f32.mrb[29].mxu1 }
0x1051   :  { %v1295_v43 = vadd.f32 %v1366_v22, %v1294_v36 }
0x1052   :  { %1319 = vst.msk [vmem:[%s2190_s8 + $0x28] sm:$0xff] %vm1313_vm4, %v1300_v35 }
0x1053   :  { %1318 = vst.msk [vmem:[%s2190_s8 + $0x20] sm:$0xff] %vm1313_vm4, %v1295_v43 }
0x111d   :  { %v1450_v44 = vpop.f32.mrb[30].mxu1 }
0x111e   :  { %v1310_v37 = vadd.f32 %v1450_v44, %v1366_v22  ;;  %v1304_v38 = vpop.f32.mrb[31].mxu1 }
0x111f   :  { %v1305_v45 = vadd.f32 %v1366_v22, %v1304_v38 }
0x1120   :  { %1321 = vst.msk [vmem:[%s2190_s8 + $0x38] sm:$0xff] %vm1313_vm4, %v1310_v37 }
0x1121   :  { %1320 = vst.msk [vmem:[%s2190_s8 + $0x30] sm:$0xff] %vm1313_vm4, %v1305_v45 }

</bundles_post_ra>
